<compile_context>
chip_gen: v6e
topology: v6e:2x2x1
jax: 0.10.0
libtpu: 0.0.40
codegen_flags: <defaults>
</compile_context>

<pallas_src>
import functools

import jax
import jax.numpy as jnp
import numpy as np
from jax.experimental import pallas as pl
from jax.experimental.pallas import tpu as pltpu


# ------------------------------ Pallas kernel ------------------------------

def _attention_kernel(q_ref, k_ref, v_ref, vim_ref, w_ref, b_ref,
                      x_ref, xim_ref, xslab_ref, imslab_ref,
                      *, num_heads, approx_recip):
    """One batch element per grid step; all heads fused in this step.

    q_ref:   (1, Nq, E)   k/v/vim_ref: (1, Nk, E)      (native dtype)
    w_ref:   (6, E, E)    pre-transposed (in, out), order q,k,v,v_im,proj,proj_im
    b_ref:   (6, E)       matching biases (scale already folded into index 0)
    xslab/imslab: (Nq, E) VMEM scratch slabs holding the merged heads.
    """
    f32 = jnp.float32
    q_in = q_ref[0]        # (Nq, E)
    k_in = k_ref[0]        # (Nk, E)
    v_in = v_ref[0]
    vim_in = vim_ref[0]
    E = q_in.shape[-1]
    Dh = E // num_heads
    dt = q_in.dtype        # native dtype for all MXU operands

    def proj(x, i):
        # native-dtype operands, f32 accumulation on the MXU
        return (jnp.dot(x, w_ref[i], preferred_element_type=f32)
                + b_ref[i].astype(f32))

    # fused full-width projections (full-E MXU faces); scale pre-folded in w[0]
    qp = proj(q_in, 0).astype(dt)          # (Nq, E)
    kp = proj(k_in, 1).astype(dt)          # (Nk, E)
    vp = proj(v_in, 2).astype(dt)          # (Nk, E)
    vimp = proj(vim_in, 3).astype(dt)      # (Nk, E)

    # contract last dims of q and k (== q @ k^T without an explicit transpose)
    qk_dims = (((1,), (1,)), ((), ()))

    # Static loop over heads; every per-head value is consumed by a store into
    # the merged-head slabs, so live ranges stay bounded (no lists / concats).
    for h in range(num_heads):
        sl = slice(h * Dh, (h + 1) * Dh)
        s = jax.lax.dot_general(qp[:, sl], kp[:, sl], qk_dims,
                                preferred_element_type=f32)     # (Nq, Nk) f32
        s = s - jnp.max(s, axis=-1, keepdims=True)
        p = jnp.exp(s)
        denom = jnp.sum(p, axis=-1, keepdims=True)
        if approx_recip:
            p = p * pl.reciprocal(denom, approx=True)           # EUP slot
        else:
            p = p / denom
        # shared attention weights applied to both value streams in ONE matmul
        vcat = jnp.concatenate([vp[:, sl], vimp[:, sl]], axis=-1)  # (Nk, 2Dh)
        o = jnp.dot(p.astype(dt), vcat, preferred_element_type=f32)  # (Nq, 2Dh)
        xslab_ref[:, sl] = o[:, :Dh].astype(dt)
        imslab_ref[:, sl] = o[:, Dh:].astype(dt)

    # output projections from the merged, lane-dense slabs (full-E contraction)
    x_out = (jnp.dot(xslab_ref[...], w_ref[4], preferred_element_type=f32)
             + b_ref[4].astype(f32))
    xim_out = (jnp.dot(imslab_ref[...], w_ref[5], preferred_element_type=f32)
               + b_ref[5].astype(f32))
    x_ref[0] = x_out.astype(x_ref.dtype)
    xim_ref[0] = xim_out.astype(xim_ref.dtype)


# -------------------------- one-time weight prep ----------------------------

def pack_attention_params(params, num_heads):
    """Pre-transpose to (in, out), fold the softmax scale into the Q
    projection and pack the 12 weight/bias operands into 2 arrays.
    Call ONCE at setup time (kept out of the per-call path)."""
    E = params["q_w"].shape[0]
    assert E % num_heads == 0, "dim must be divisible by num_heads"
    scale = (E // num_heads) ** (-0.5)
    names = ("q", "k", "v", "v_im", "proj", "proj_im")
    ws = [jnp.transpose(params[n + "_w"]) for n in names]   # torch (out,in)->(in,out)
    bs = [params[n + "_b"] for n in names]
    ws[0] = ws[0] * scale
    bs[0] = bs[0] * scale
    return jnp.stack(ws), jnp.stack(bs)                     # (6,E,E), (6,E)


def _pick_vmem_limit():
    # Bigger pipeline tiles are the main lever on the 128 MiB (v5e/v6e) parts;
    # v7x only has 64 MiB physical VMEM, so stay well below the capacity.
    try:
        cap = int(pltpu.get_tpu_info().vmem_capacity_bytes)
    except Exception:
        return None
    return max(32 << 20, min(cap - (16 << 20), 100 << 20))


# -------------------------------- wrapper ----------------------------------

def attention_forward(w_packed, b_packed, q, k, v, v_img, *, num_heads,
                      approx_recip=True):
    """PyTorch Attention.forward (inference; dropout = identity, no masks).

    q: (N_q, B, E); k, v, v_img: (N_k, B, E)  (seq-first, like the module).
    Returns (x, x_im), each (B, N_q, E) (batch-first, like the module).
    """
    N_q, B, E = q.shape
    N_k = k.shape[0]
    assert E % num_heads == 0, "dim must be divisible by num_heads"

    # The module's leading .permute(1, 0, 2): seq-first -> batch-first.
    qb = jnp.transpose(q, (1, 0, 2))
    kb = jnp.transpose(k, (1, 0, 2))
    vb = jnp.transpose(v, (1, 0, 2))
    vimb = jnp.transpose(v_img, (1, 0, 2))

    kern = functools.partial(_attention_kernel, num_heads=num_heads,
                             approx_recip=approx_recip)

    def act_spec(T):
        return pl.BlockSpec((1, T, E), lambda b: (b, 0, 0))

    x, x_im = pl.pallas_call(
        kern,
        out_shape=(jax.ShapeDtypeStruct((B, N_q, E), q.dtype),
                   jax.ShapeDtypeStruct((B, N_q, E), q.dtype)),
        grid=(B,),
        in_specs=[act_spec(N_q), act_spec(N_k), act_spec(N_k), act_spec(N_k),
                  pl.BlockSpec((6, E, E), lambda b: (0, 0, 0)),   # weights
                  pl.BlockSpec((6, E), lambda b: (0, 0))],        # biases
        out_specs=(pl.BlockSpec((1, N_q, E), lambda b: (b, 0, 0)),
                   pl.BlockSpec((1, N_q, E), lambda b: (b, 0, 0))),
        scratch_shapes=[pltpu.VMEM((N_q, E), q.dtype),   # merged x heads
                        pltpu.VMEM((N_q, E), q.dtype)],  # merged x_im heads
        compiler_params=pltpu.CompilerParams(
            dimension_semantics=("parallel",),
            vmem_limit_bytes=_pick_vmem_limit()),
    )(qb, kb, vb, vimb, w_packed, b_packed)
    return x, x_im


# ----------------------------- parameter init -------------------------------

def init_params(key, E, qkv_bias=True):
    keys = iter(jax.random.split(key, 16))

    def w(shape, scale=0.05):
        return jax.random.normal(next(keys), shape, jnp.float32) * scale

    p = {}
    for nm in ("q", "k", "v", "v_im", "proj", "proj_im"):
        p[f"{nm}_w"] = w((E, E))                       # torch layout (out, in)
        if nm in ("proj", "proj_im") or qkv_bias:
            p[f"{nm}_b"] = w((E,))
        else:
            p[f"{nm}_b"] = jnp.zeros((E,), jnp.float32)
    return p


# --------------------------- pure-JAX reference -----------------------------

def reference_forward(params, q, k, v, v_img, num_heads):
    E = q.shape[-1]
    Dh = E // num_heads
    scale = Dh ** (-0.5)

    def lin(x, w, b):
        return x @ w.T + b

    qb = jnp.transpose(q, (1, 0, 2))
    kb = jnp.transpose(k, (1, 0, 2))
    vb = jnp.transpose(v, (1, 0, 2))
    vimb = jnp.transpose(v_img, (1, 0, 2))

    qp = lin(qb, params["q_w"], params["q_b"])
    kp = lin(kb, params["k_w"], params["k_b"])
    vp = lin(vb, params["v_w"], params["v_b"])
    vimp = lin(vimb, params["v_im_w"], params["v_im_b"])

    B, Nq, _ = qp.shape

    def sh(x):
        Bx, Nx, _ = x.shape
        return x.reshape(Bx, Nx, num_heads, Dh).transpose(0, 2, 1, 3)

    qh, kh, vh, vimh = sh(qp), sh(kp), sh(vp), sh(vimp)
    attn = jnp.einsum("bhqd,bhkd->bhqk", qh, kh) * scale
    attn = jax.nn.softmax(attn, axis=-1)
    x = jnp.einsum("bhqk,bhkd->bhqd", attn, vh)
    x = x.transpose(0, 2, 1, 3).reshape(B, Nq, E)
    x_im = jnp.einsum("bhqk,bhkd->bhqd", attn, vimh)
    x_im = x_im.transpose(0, 2, 1, 3).reshape(B, Nq, E)
    x = lin(x, params["proj_w"], params["proj_b"])
    x_im = lin(x_im, params["proj_im_w"], params["proj_im_b"])
    return x, x_im


# ----------------------------------- main -----------------------------------

if __name__ == "__main__":
    N_q, N_k, B, E, H = 8, 16, 2, 32, 4     # dim=32, num_heads=4 (head_dim=8)
    key = jax.random.PRNGKey(0)
    k_in, k_par = jax.random.split(key)
    ks = jax.random.split(k_in, 4)

    # PyTorch layout: (seq, batch, dim) inputs
    q = jax.random.normal(ks[0], (N_q, B, E), jnp.float32)
    k = jax.random.normal(ks[1], (N_k, B, E), jnp.float32)
    v = jax.random.normal(ks[2], (N_k, B, E), jnp.float32)
    v_img = jax.random.normal(ks[3], (N_k, B, E), jnp.float32)

    params = init_params(k_par, E, qkv_bias=True)

    # one-time prep (pre-transpose + pack + scale fold), outside the call path
    w_packed, b_packed = pack_attention_params(params, H)

    fwd = jax.jit(functools.partial(attention_forward, num_heads=H))
    x, x_im = fwd(w_packed, b_packed, q, k, v, v_img)
    jax.block_until_ready((x, x_im))

    ref_x, ref_x_im = reference_forward(params, q, k, v, v_img, H)
    assert x.shape == (B, N_q, E) and x_im.shape == (B, N_q, E)
    np.testing.assert_allclose(np.asarray(x), np.asarray(ref_x),
                               rtol=1e-2, atol=1e-2)
    np.testing.assert_allclose(np.asarray(x_im), np.asarray(ref_x_im),
                               rtol=1e-2, atol=1e-2)
    print("KERNEL_OK")
</pallas_src>

<mosaic_0001>
module attributes {stable_mosaic.version = 11 : i64} {
  func.func @_attention_kernel(%arg0: i32, %arg1: memref<1x8x32xf32, #tpu.memory_space<vmem>>, %arg2: memref<1x16x32xf32, #tpu.memory_space<vmem>>, %arg3: memref<1x16x32xf32, #tpu.memory_space<vmem>>, %arg4: memref<1x16x32xf32, #tpu.memory_space<vmem>>, %arg5: memref<6x32x32xf32, #tpu.memory_space<vmem>>, %arg6: memref<6x32xf32, #tpu.memory_space<vmem>>, %arg7: memref<1x8x32xf32, #tpu.memory_space<vmem>>, %arg8: memref<1x8x32xf32, #tpu.memory_space<vmem>>, %arg9: memref<8x32xf32, #tpu.memory_space<vmem>>, %arg10: memref<8x32xf32, #tpu.memory_space<vmem>>) attributes {dimension_semantics = [#tpu.dimension_semantics<parallel>], iteration_bounds = array<i64: 2>, scalar_prefetch = 0 : i64, scratch_operands = 2 : i64, tpu.core_type = #tpu.core_type<tc>, window_params = [{transform_indices = @transform_0, window_bounds = array<i64: 1, 8, 32>}, {transform_indices = @transform_1, window_bounds = array<i64: 1, 16, 32>}, {transform_indices = @transform_2, window_bounds = array<i64: 1, 16, 32>}, {transform_indices = @transform_3, window_bounds = array<i64: 1, 16, 32>}, {pipeline_mode = #tpu.pipeline_mode<synchronous>, transform_indices = @transform_4, window_bounds = array<i64: 6, 32, 32>}, {pipeline_mode = #tpu.pipeline_mode<synchronous>, transform_indices = @transform_5, window_bounds = array<i64: 6, 32>}, {transform_indices = @transform_6, window_bounds = array<i64: 1, 8, 32>}, {transform_indices = @transform_7, window_bounds = array<i64: 1, 8, 32>}]} {
    %c0 = arith.constant 0 : index
    %c0_0 = arith.constant 0 : index
    %c0_1 = arith.constant 0 : index
    %0 = vector.load %arg1[%c0, %c0_0, %c0_1] : memref<1x8x32xf32, #tpu.memory_space<vmem>>, vector<1x8x32xf32>
    %1 = vector.shape_cast %0 : vector<1x8x32xf32> to vector<8x32xf32>
    %c0_2 = arith.constant 0 : index
    %c0_3 = arith.constant 0 : index
    %c0_4 = arith.constant 0 : index
    %2 = vector.load %arg2[%c0_2, %c0_3, %c0_4] : memref<1x16x32xf32, #tpu.memory_space<vmem>>, vector<1x16x32xf32>
    %3 = vector.shape_cast %2 : vector<1x16x32xf32> to vector<16x32xf32>
    %c0_5 = arith.constant 0 : index
    %c0_6 = arith.constant 0 : index
    %c0_7 = arith.constant 0 : index
    %4 = vector.load %arg3[%c0_5, %c0_6, %c0_7] : memref<1x16x32xf32, #tpu.memory_space<vmem>>, vector<1x16x32xf32>
    %5 = vector.shape_cast %4 : vector<1x16x32xf32> to vector<16x32xf32>
    %c0_8 = arith.constant 0 : index
    %c0_9 = arith.constant 0 : index
    %c0_10 = arith.constant 0 : index
    %6 = vector.load %arg4[%c0_8, %c0_9, %c0_10] : memref<1x16x32xf32, #tpu.memory_space<vmem>>, vector<1x16x32xf32>
    %7 = vector.shape_cast %6 : vector<1x16x32xf32> to vector<16x32xf32>
    %c0_11 = arith.constant 0 : index
    %c0_12 = arith.constant 0 : index
    %c0_13 = arith.constant 0 : index
    %8 = vector.load %arg5[%c0_11, %c0_12, %c0_13] : memref<6x32x32xf32, #tpu.memory_space<vmem>>, vector<1x32x32xf32>
    %9 = vector.shape_cast %8 : vector<1x32x32xf32> to vector<32x32xf32>
    %cst = arith.constant dense<0.000000e+00> : vector<8x32xf32>
    %10 = tpu.matmul %1, %9, %cst {dimension_numbers = #tpu.dot_dimension_numbers<[1], [0], [0], [1], [0, 0, 1, 1], [], []>} : vector<8x32xf32>, vector<32x32xf32>, vector<8x32xf32> -> vector<8x32xf32>
    %c0_14 = arith.constant 0 : index
    %c0_15 = arith.constant 0 : index
    %11 = vector.load %arg6[%c0_14, %c0_15] : memref<6x32xf32, #tpu.memory_space<vmem>>, vector<1x32xf32>
    %12 = vector.shape_cast %11 : vector<1x32xf32> to vector<32xf32>
    %13 = vector.shape_cast %12 : vector<32xf32> to vector<1x32xf32>
    %14 = vector.broadcast %13 : vector<1x32xf32> to vector<8x32xf32>
    %15 = arith.addf %10, %14 : vector<8x32xf32>
    %c1 = arith.constant 1 : index
    %c0_16 = arith.constant 0 : index
    %c0_17 = arith.constant 0 : index
    %16 = vector.load %arg5[%c1, %c0_16, %c0_17] : memref<6x32x32xf32, #tpu.memory_space<vmem>>, vector<1x32x32xf32>
    %17 = vector.shape_cast %16 : vector<1x32x32xf32> to vector<32x32xf32>
    %cst_18 = arith.constant dense<0.000000e+00> : vector<16x32xf32>
    %18 = tpu.matmul %3, %17, %cst_18 {dimension_numbers = #tpu.dot_dimension_numbers<[1], [0], [0], [1], [0, 0, 1, 1], [], []>} : vector<16x32xf32>, vector<32x32xf32>, vector<16x32xf32> -> vector<16x32xf32>
    %c1_19 = arith.constant 1 : index
    %c0_20 = arith.constant 0 : index
    %19 = vector.load %arg6[%c1_19, %c0_20] : memref<6x32xf32, #tpu.memory_space<vmem>>, vector<1x32xf32>
    %20 = vector.shape_cast %19 : vector<1x32xf32> to vector<32xf32>
    %21 = vector.shape_cast %20 : vector<32xf32> to vector<1x32xf32>
    %22 = vector.broadcast %21 : vector<1x32xf32> to vector<16x32xf32>
    %23 = arith.addf %18, %22 : vector<16x32xf32>
    %c2 = arith.constant 2 : index
    %c0_21 = arith.constant 0 : index
    %c0_22 = arith.constant 0 : index
    %24 = vector.load %arg5[%c2, %c0_21, %c0_22] : memref<6x32x32xf32, #tpu.memory_space<vmem>>, vector<1x32x32xf32>
    %25 = vector.shape_cast %24 : vector<1x32x32xf32> to vector<32x32xf32>
    %cst_23 = arith.constant dense<0.000000e+00> : vector<16x32xf32>
    %26 = tpu.matmul %5, %25, %cst_23 {dimension_numbers = #tpu.dot_dimension_numbers<[1], [0], [0], [1], [0, 0, 1, 1], [], []>} : vector<16x32xf32>, vector<32x32xf32>, vector<16x32xf32> -> vector<16x32xf32>
    %c2_24 = arith.constant 2 : index
    %c0_25 = arith.constant 0 : index
    %27 = vector.load %arg6[%c2_24, %c0_25] : memref<6x32xf32, #tpu.memory_space<vmem>>, vector<1x32xf32>
    %28 = vector.shape_cast %27 : vector<1x32xf32> to vector<32xf32>
    %29 = vector.shape_cast %28 : vector<32xf32> to vector<1x32xf32>
    %30 = vector.broadcast %29 : vector<1x32xf32> to vector<16x32xf32>
    %31 = arith.addf %26, %30 : vector<16x32xf32>
    %c3 = arith.constant 3 : index
    %c0_26 = arith.constant 0 : index
    %c0_27 = arith.constant 0 : index
    %32 = vector.load %arg5[%c3, %c0_26, %c0_27] : memref<6x32x32xf32, #tpu.memory_space<vmem>>, vector<1x32x32xf32>
    %33 = vector.shape_cast %32 : vector<1x32x32xf32> to vector<32x32xf32>
    %cst_28 = arith.constant dense<0.000000e+00> : vector<16x32xf32>
    %34 = tpu.matmul %7, %33, %cst_28 {dimension_numbers = #tpu.dot_dimension_numbers<[1], [0], [0], [1], [0, 0, 1, 1], [], []>} : vector<16x32xf32>, vector<32x32xf32>, vector<16x32xf32> -> vector<16x32xf32>
    %c3_29 = arith.constant 3 : index
    %c0_30 = arith.constant 0 : index
    %35 = vector.load %arg6[%c3_29, %c0_30] : memref<6x32xf32, #tpu.memory_space<vmem>>, vector<1x32xf32>
    %36 = vector.shape_cast %35 : vector<1x32xf32> to vector<32xf32>
    %37 = vector.shape_cast %36 : vector<32xf32> to vector<1x32xf32>
    %38 = vector.broadcast %37 : vector<1x32xf32> to vector<16x32xf32>
    %39 = arith.addf %34, %38 : vector<16x32xf32>
    %40 = vector.extract_strided_slice %15 {offsets = [0, 0], sizes = [8, 8], strides = [1, 1]} : vector<8x32xf32> to vector<8x8xf32>
    %41 = vector.extract_strided_slice %23 {offsets = [0, 0], sizes = [16, 8], strides = [1, 1]} : vector<16x32xf32> to vector<16x8xf32>
    %cst_31 = arith.constant dense<0.000000e+00> : vector<8x16xf32>
    %42 = tpu.matmul %40, %41, %cst_31 {dimension_numbers = #tpu.dot_dimension_numbers<[1], [1], [0], [0], [0, 0, 1, 0], [], []>} : vector<8x8xf32>, vector<16x8xf32>, vector<8x16xf32> -> vector<8x16xf32>
    %cst_32 = arith.constant dense<0xFF800000> : vector<8xf32>
    %43 = vector.multi_reduction <maximumf>, %42, %cst_32 [1] : vector<8x16xf32> to vector<8xf32>
    %44 = vector.shape_cast %43 : vector<8xf32> to vector<8x1xf32>
    %45 = vector.broadcast %44 : vector<8x1xf32> to vector<8x16xf32>
    %46 = arith.subf %42, %45 : vector<8x16xf32>
    %47 = math.exp %46 : vector<8x16xf32>
    %cst_33 = arith.constant dense<0.000000e+00> : vector<8xf32>
    %48 = vector.multi_reduction <add>, %47, %cst_33 [1] : vector<8x16xf32> to vector<8xf32>
    %49 = vector.shape_cast %48 : vector<8xf32> to vector<8x1xf32>
    %50 = tpu.reciprocal %49 {approx = true} : vector<8x1xf32> -> vector<8x1xf32>
    %51 = vector.broadcast %50 : vector<8x1xf32> to vector<8x16xf32>
    %52 = arith.mulf %47, %51 : vector<8x16xf32>
    %53 = vector.extract_strided_slice %31 {offsets = [0, 0], sizes = [16, 8], strides = [1, 1]} : vector<16x32xf32> to vector<16x8xf32>
    %54 = vector.extract_strided_slice %39 {offsets = [0, 0], sizes = [16, 8], strides = [1, 1]} : vector<16x32xf32> to vector<16x8xf32>
    %55 = tpu.concatenate %53, %54 in 1 : vector<16x8xf32>, vector<16x8xf32> -> vector<16x16xf32>
    %cst_34 = arith.constant dense<0.000000e+00> : vector<8x16xf32>
    %56 = tpu.matmul %52, %55, %cst_34 {dimension_numbers = #tpu.dot_dimension_numbers<[1], [0], [0], [1], [0, 0, 1, 1], [], []>} : vector<8x16xf32>, vector<16x16xf32>, vector<8x16xf32> -> vector<8x16xf32>
    %57 = vector.extract_strided_slice %56 {offsets = [0, 0], sizes = [8, 8], strides = [1, 1]} : vector<8x16xf32> to vector<8x8xf32>
    %c0_35 = arith.constant 0 : index
    %c0_36 = arith.constant 0 : index
    %58 = vector.load %arg9[%c0_35, %c0_36] : memref<8x32xf32, #tpu.memory_space<vmem>>, vector<8x8xf32>
    tpu.vector_store %arg9[%c0_35, %c0_36], %57 {strides = array<i32>} : memref<8x32xf32, #tpu.memory_space<vmem>>, vector<8x8xf32>,
    %59 = vector.extract_strided_slice %56 {offsets = [0, 8], sizes = [8, 8], strides = [1, 1]} : vector<8x16xf32> to vector<8x8xf32>
    %c0_37 = arith.constant 0 : index
    %c0_38 = arith.constant 0 : index
    %60 = vector.load %arg10[%c0_37, %c0_38] : memref<8x32xf32, #tpu.memory_space<vmem>>, vector<8x8xf32>
    tpu.vector_store %arg10[%c0_37, %c0_38], %59 {strides = array<i32>} : memref<8x32xf32, #tpu.memory_space<vmem>>, vector<8x8xf32>,
    %61 = vector.extract_strided_slice %15 {offsets = [0, 8], sizes = [8, 8], strides = [1, 1]} : vector<8x32xf32> to vector<8x8xf32>
    %62 = vector.extract_strided_slice %23 {offsets = [0, 8], sizes = [16, 8], strides = [1, 1]} : vector<16x32xf32> to vector<16x8xf32>
    %cst_39 = arith.constant dense<0.000000e+00> : vector<8x16xf32>
    %63 = tpu.matmul %61, %62, %cst_39 {dimension_numbers = #tpu.dot_dimension_numbers<[1], [1], [0], [0], [0, 0, 1, 0], [], []>} : vector<8x8xf32>, vector<16x8xf32>, vector<8x16xf32> -> vector<8x16xf32>
    %cst_40 = arith.constant dense<0xFF800000> : vector<8xf32>
    %64 = vector.multi_reduction <maximumf>, %63, %cst_40 [1] : vector<8x16xf32> to vector<8xf32>
    %65 = vector.shape_cast %64 : vector<8xf32> to vector<8x1xf32>
    %66 = vector.broadcast %65 : vector<8x1xf32> to vector<8x16xf32>
    %67 = arith.subf %63, %66 : vector<8x16xf32>
    %68 = math.exp %67 : vector<8x16xf32>
    %cst_41 = arith.constant dense<0.000000e+00> : vector<8xf32>
    %69 = vector.multi_reduction <add>, %68, %cst_41 [1] : vector<8x16xf32> to vector<8xf32>
    %70 = vector.shape_cast %69 : vector<8xf32> to vector<8x1xf32>
    %71 = tpu.reciprocal %70 {approx = true} : vector<8x1xf32> -> vector<8x1xf32>
    %72 = vector.broadcast %71 : vector<8x1xf32> to vector<8x16xf32>
    %73 = arith.mulf %68, %72 : vector<8x16xf32>
    %74 = vector.extract_strided_slice %31 {offsets = [0, 8], sizes = [16, 8], strides = [1, 1]} : vector<16x32xf32> to vector<16x8xf32>
    %75 = vector.extract_strided_slice %39 {offsets = [0, 8], sizes = [16, 8], strides = [1, 1]} : vector<16x32xf32> to vector<16x8xf32>
    %76 = tpu.concatenate %74, %75 in 1 : vector<16x8xf32>, vector<16x8xf32> -> vector<16x16xf32>
    %cst_42 = arith.constant dense<0.000000e+00> : vector<8x16xf32>
    %77 = tpu.matmul %73, %76, %cst_42 {dimension_numbers = #tpu.dot_dimension_numbers<[1], [0], [0], [1], [0, 0, 1, 1], [], []>} : vector<8x16xf32>, vector<16x16xf32>, vector<8x16xf32> -> vector<8x16xf32>
    %78 = vector.extract_strided_slice %77 {offsets = [0, 0], sizes = [8, 8], strides = [1, 1]} : vector<8x16xf32> to vector<8x8xf32>
    %c0_43 = arith.constant 0 : index
    %c8 = arith.constant 8 : index
    %79 = vector.load %arg9[%c0_43, %c8] : memref<8x32xf32, #tpu.memory_space<vmem>>, vector<8x8xf32>
    tpu.vector_store %arg9[%c0_43, %c8], %78 {strides = array<i32>} : memref<8x32xf32, #tpu.memory_space<vmem>>, vector<8x8xf32>,
    %80 = vector.extract_strided_slice %77 {offsets = [0, 8], sizes = [8, 8], strides = [1, 1]} : vector<8x16xf32> to vector<8x8xf32>
    %c0_44 = arith.constant 0 : index
    %c8_45 = arith.constant 8 : index
    %81 = vector.load %arg10[%c0_44, %c8_45] : memref<8x32xf32, #tpu.memory_space<vmem>>, vector<8x8xf32>
    tpu.vector_store %arg10[%c0_44, %c8_45], %80 {strides = array<i32>} : memref<8x32xf32, #tpu.memory_space<vmem>>, vector<8x8xf32>,
    %82 = vector.extract_strided_slice %15 {offsets = [0, 16], sizes = [8, 8], strides = [1, 1]} : vector<8x32xf32> to vector<8x8xf32>
    %83 = vector.extract_strided_slice %23 {offsets = [0, 16], sizes = [16, 8], strides = [1, 1]} : vector<16x32xf32> to vector<16x8xf32>
    %cst_46 = arith.constant dense<0.000000e+00> : vector<8x16xf32>
    %84 = tpu.matmul %82, %83, %cst_46 {dimension_numbers = #tpu.dot_dimension_numbers<[1], [1], [0], [0], [0, 0, 1, 0], [], []>} : vector<8x8xf32>, vector<16x8xf32>, vector<8x16xf32> -> vector<8x16xf32>
    %cst_47 = arith.constant dense<0xFF800000> : vector<8xf32>
    %85 = vector.multi_reduction <maximumf>, %84, %cst_47 [1] : vector<8x16xf32> to vector<8xf32>
    %86 = vector.shape_cast %85 : vector<8xf32> to vector<8x1xf32>
    %87 = vector.broadcast %86 : vector<8x1xf32> to vector<8x16xf32>
    %88 = arith.subf %84, %87 : vector<8x16xf32>
    %89 = math.exp %88 : vector<8x16xf32>
    %cst_48 = arith.constant dense<0.000000e+00> : vector<8xf32>
    %90 = vector.multi_reduction <add>, %89, %cst_48 [1] : vector<8x16xf32> to vector<8xf32>
    %91 = vector.shape_cast %90 : vector<8xf32> to vector<8x1xf32>
    %92 = tpu.reciprocal %91 {approx = true} : vector<8x1xf32> -> vector<8x1xf32>
    %93 = vector.broadcast %92 : vector<8x1xf32> to vector<8x16xf32>
    %94 = arith.mulf %89, %93 : vector<8x16xf32>
    %95 = vector.extract_strided_slice %31 {offsets = [0, 16], sizes = [16, 8], strides = [1, 1]} : vector<16x32xf32> to vector<16x8xf32>
    %96 = vector.extract_strided_slice %39 {offsets = [0, 16], sizes = [16, 8], strides = [1, 1]} : vector<16x32xf32> to vector<16x8xf32>
    %97 = tpu.concatenate %95, %96 in 1 : vector<16x8xf32>, vector<16x8xf32> -> vector<16x16xf32>
    %cst_49 = arith.constant dense<0.000000e+00> : vector<8x16xf32>
    %98 = tpu.matmul %94, %97, %cst_49 {dimension_numbers = #tpu.dot_dimension_numbers<[1], [0], [0], [1], [0, 0, 1, 1], [], []>} : vector<8x16xf32>, vector<16x16xf32>, vector<8x16xf32> -> vector<8x16xf32>
    %99 = vector.extract_strided_slice %98 {offsets = [0, 0], sizes = [8, 8], strides = [1, 1]} : vector<8x16xf32> to vector<8x8xf32>
    %c0_50 = arith.constant 0 : index
    %c16 = arith.constant 16 : index
    %100 = vector.load %arg9[%c0_50, %c16] : memref<8x32xf32, #tpu.memory_space<vmem>>, vector<8x8xf32>
    tpu.vector_store %arg9[%c0_50, %c16], %99 {strides = array<i32>} : memref<8x32xf32, #tpu.memory_space<vmem>>, vector<8x8xf32>,
    %101 = vector.extract_strided_slice %98 {offsets = [0, 8], sizes = [8, 8], strides = [1, 1]} : vector<8x16xf32> to vector<8x8xf32>
    %c0_51 = arith.constant 0 : index
    %c16_52 = arith.constant 16 : index
    %102 = vector.load %arg10[%c0_51, %c16_52] : memref<8x32xf32, #tpu.memory_space<vmem>>, vector<8x8xf32>
    tpu.vector_store %arg10[%c0_51, %c16_52], %101 {strides = array<i32>} : memref<8x32xf32, #tpu.memory_space<vmem>>, vector<8x8xf32>,
    %103 = vector.extract_strided_slice %15 {offsets = [0, 24], sizes = [8, 8], strides = [1, 1]} : vector<8x32xf32> to vector<8x8xf32>
    %104 = vector.extract_strided_slice %23 {offsets = [0, 24], sizes = [16, 8], strides = [1, 1]} : vector<16x32xf32> to vector<16x8xf32>
    %cst_53 = arith.constant dense<0.000000e+00> : vector<8x16xf32>
    %105 = tpu.matmul %103, %104, %cst_53 {dimension_numbers = #tpu.dot_dimension_numbers<[1], [1], [0], [0], [0, 0, 1, 0], [], []>} : vector<8x8xf32>, vector<16x8xf32>, vector<8x16xf32> -> vector<8x16xf32>
    %cst_54 = arith.constant dense<0xFF800000> : vector<8xf32>
    %106 = vector.multi_reduction <maximumf>, %105, %cst_54 [1] : vector<8x16xf32> to vector<8xf32>
    %107 = vector.shape_cast %106 : vector<8xf32> to vector<8x1xf32>
    %108 = vector.broadcast %107 : vector<8x1xf32> to vector<8x16xf32>
    %109 = arith.subf %105, %108 : vector<8x16xf32>
    %110 = math.exp %109 : vector<8x16xf32>
    %cst_55 = arith.constant dense<0.000000e+00> : vector<8xf32>
    %111 = vector.multi_reduction <add>, %110, %cst_55 [1] : vector<8x16xf32> to vector<8xf32>
    %112 = vector.shape_cast %111 : vector<8xf32> to vector<8x1xf32>
    %113 = tpu.reciprocal %112 {approx = true} : vector<8x1xf32> -> vector<8x1xf32>
    %114 = vector.broadcast %113 : vector<8x1xf32> to vector<8x16xf32>
    %115 = arith.mulf %110, %114 : vector<8x16xf32>
    %116 = vector.extract_strided_slice %31 {offsets = [0, 24], sizes = [16, 8], strides = [1, 1]} : vector<16x32xf32> to vector<16x8xf32>
    %117 = vector.extract_strided_slice %39 {offsets = [0, 24], sizes = [16, 8], strides = [1, 1]} : vector<16x32xf32> to vector<16x8xf32>
    %118 = tpu.concatenate %116, %117 in 1 : vector<16x8xf32>, vector<16x8xf32> -> vector<16x16xf32>
    %cst_56 = arith.constant dense<0.000000e+00> : vector<8x16xf32>
    %119 = tpu.matmul %115, %118, %cst_56 {dimension_numbers = #tpu.dot_dimension_numbers<[1], [0], [0], [1], [0, 0, 1, 1], [], []>} : vector<8x16xf32>, vector<16x16xf32>, vector<8x16xf32> -> vector<8x16xf32>
    %120 = vector.extract_strided_slice %119 {offsets = [0, 0], sizes = [8, 8], strides = [1, 1]} : vector<8x16xf32> to vector<8x8xf32>
    %c0_57 = arith.constant 0 : index
    %c24 = arith.constant 24 : index
    %121 = vector.load %arg9[%c0_57, %c24] : memref<8x32xf32, #tpu.memory_space<vmem>>, vector<8x8xf32>
    tpu.vector_store %arg9[%c0_57, %c24], %120 {strides = array<i32>} : memref<8x32xf32, #tpu.memory_space<vmem>>, vector<8x8xf32>,
    %122 = vector.extract_strided_slice %119 {offsets = [0, 8], sizes = [8, 8], strides = [1, 1]} : vector<8x16xf32> to vector<8x8xf32>
    %c0_58 = arith.constant 0 : index
    %c24_59 = arith.constant 24 : index
    %123 = vector.load %arg10[%c0_58, %c24_59] : memref<8x32xf32, #tpu.memory_space<vmem>>, vector<8x8xf32>
    tpu.vector_store %arg10[%c0_58, %c24_59], %122 {strides = array<i32>} : memref<8x32xf32, #tpu.memory_space<vmem>>, vector<8x8xf32>,
    %c0_60 = arith.constant 0 : index
    %c0_61 = arith.constant 0 : index
    %124 = vector.load %arg9[%c0_60, %c0_61] : memref<8x32xf32, #tpu.memory_space<vmem>>, vector<8x32xf32>
    %c4 = arith.constant 4 : index
    %c0_62 = arith.constant 0 : index
    %c0_63 = arith.constant 0 : index
    %125 = vector.load %arg5[%c4, %c0_62, %c0_63] : memref<6x32x32xf32, #tpu.memory_space<vmem>>, vector<1x32x32xf32>
    %126 = vector.shape_cast %125 : vector<1x32x32xf32> to vector<32x32xf32>
    %cst_64 = arith.constant dense<0.000000e+00> : vector<8x32xf32>
    %127 = tpu.matmul %124, %126, %cst_64 {dimension_numbers = #tpu.dot_dimension_numbers<[1], [0], [0], [1], [0, 0, 1, 1], [], []>} : vector<8x32xf32>, vector<32x32xf32>, vector<8x32xf32> -> vector<8x32xf32>
    %c4_65 = arith.constant 4 : index
    %c0_66 = arith.constant 0 : index
    %128 = vector.load %arg6[%c4_65, %c0_66] : memref<6x32xf32, #tpu.memory_space<vmem>>, vector<1x32xf32>
    %129 = vector.shape_cast %128 : vector<1x32xf32> to vector<32xf32>
    %130 = vector.shape_cast %129 : vector<32xf32> to vector<1x32xf32>
    %131 = vector.broadcast %130 : vector<1x32xf32> to vector<8x32xf32>
    %132 = arith.addf %127, %131 : vector<8x32xf32>
    %c0_67 = arith.constant 0 : index
    %c0_68 = arith.constant 0 : index
    %133 = vector.load %arg10[%c0_67, %c0_68] : memref<8x32xf32, #tpu.memory_space<vmem>>, vector<8x32xf32>
    %c5 = arith.constant 5 : index
    %c0_69 = arith.constant 0 : index
    %c0_70 = arith.constant 0 : index
    %134 = vector.load %arg5[%c5, %c0_69, %c0_70] : memref<6x32x32xf32, #tpu.memory_space<vmem>>, vector<1x32x32xf32>
    %135 = vector.shape_cast %134 : vector<1x32x32xf32> to vector<32x32xf32>
    %cst_71 = arith.constant dense<0.000000e+00> : vector<8x32xf32>
    %136 = tpu.matmul %133, %135, %cst_71 {dimension_numbers = #tpu.dot_dimension_numbers<[1], [0], [0], [1], [0, 0, 1, 1], [], []>} : vector<8x32xf32>, vector<32x32xf32>, vector<8x32xf32> -> vector<8x32xf32>
    %c5_72 = arith.constant 5 : index
    %c0_73 = arith.constant 0 : index
    %137 = vector.load %arg6[%c5_72, %c0_73] : memref<6x32xf32, #tpu.memory_space<vmem>>, vector<1x32xf32>
    %138 = vector.shape_cast %137 : vector<1x32xf32> to vector<32xf32>
    %139 = vector.shape_cast %138 : vector<32xf32> to vector<1x32xf32>
    %140 = vector.broadcast %139 : vector<1x32xf32> to vector<8x32xf32>
    %141 = arith.addf %136, %140 : vector<8x32xf32>
    %c0_74 = arith.constant 0 : index
    %c0_75 = arith.constant 0 : index
    %c0_76 = arith.constant 0 : index
    %142 = vector.load %arg7[%c0_74, %c0_75, %c0_76] : memref<1x8x32xf32, #tpu.memory_space<vmem>>, vector<1x8x32xf32>
    %143 = vector.shape_cast %142 : vector<1x8x32xf32> to vector<8x32xf32>
    %144 = vector.shape_cast %132 : vector<8x32xf32> to vector<1x8x32xf32>
    tpu.vector_store %arg7[%c0_74, %c0_75, %c0_76], %144 {strides = array<i32>} : memref<1x8x32xf32, #tpu.memory_space<vmem>>, vector<1x8x32xf32>,
    %c0_77 = arith.constant 0 : index
    %c0_78 = arith.constant 0 : index
    %c0_79 = arith.constant 0 : index
    %145 = vector.load %arg8[%c0_77, %c0_78, %c0_79] : memref<1x8x32xf32, #tpu.memory_space<vmem>>, vector<1x8x32xf32>
    %146 = vector.shape_cast %145 : vector<1x8x32xf32> to vector<8x32xf32>
    %147 = vector.shape_cast %141 : vector<8x32xf32> to vector<1x8x32xf32>
    tpu.vector_store %arg8[%c0_77, %c0_78, %c0_79], %147 {strides = array<i32>} : memref<1x8x32xf32, #tpu.memory_space<vmem>>, vector<1x8x32xf32>,
    return
  }
  func.func @transform_0(%arg0: i32) -> (i32, i32, i32) {
    %c0_i32 = arith.constant 0 : i32
    %c0_i32_0 = arith.constant 0 : i32
    %c0_i32_1 = arith.constant 0 : i32
    return %arg0, %c0_i32, %c0_i32_0 : i32, i32, i32
  }
  func.func @transform_1(%arg0: i32) -> (i32, i32, i32) {
    %c0_i32 = arith.constant 0 : i32
    %c0_i32_0 = arith.constant 0 : i32
    %c0_i32_1 = arith.constant 0 : i32
    return %arg0, %c0_i32, %c0_i32_0 : i32, i32, i32
  }
  func.func @transform_2(%arg0: i32) -> (i32, i32, i32) {
    %c0_i32 = arith.constant 0 : i32
    %c0_i32_0 = arith.constant 0 : i32
    %c0_i32_1 = arith.constant 0 : i32
    return %arg0, %c0_i32, %c0_i32_0 : i32, i32, i32
  }
  func.func @transform_3(%arg0: i32) -> (i32, i32, i32) {
    %c0_i32 = arith.constant 0 : i32
    %c0_i32_0 = arith.constant 0 : i32
    %c0_i32_1 = arith.constant 0 : i32
    return %arg0, %c0_i32, %c0_i32_0 : i32, i32, i32
  }
  func.func @transform_4(%arg0: i32) -> (i32, i32, i32) {
    %c0_i32 = arith.constant 0 : i32
    %c0_i32_0 = arith.constant 0 : i32
    %c0_i32_1 = arith.constant 0 : i32
    %c0_i32_2 = arith.constant 0 : i32
    return %c0_i32, %c0_i32_0, %c0_i32_1 : i32, i32, i32
  }
  func.func @transform_5(%arg0: i32) -> (i32, i32) {
    %c0_i32 = arith.constant 0 : i32
    %c0_i32_0 = arith.constant 0 : i32
    %c0_i32_1 = arith.constant 0 : i32
    return %c0_i32, %c0_i32_0 : i32, i32
  }
  func.func @transform_6(%arg0: i32) -> (i32, i32, i32) {
    %c0_i32 = arith.constant 0 : i32
    %c0_i32_0 = arith.constant 0 : i32
    %c0_i32_1 = arith.constant 0 : i32
    return %arg0, %c0_i32, %c0_i32_0 : i32, i32, i32
  }
  func.func @transform_7(%arg0: i32) -> (i32, i32, i32) {
    %c0_i32 = arith.constant 0 : i32
    %c0_i32_0 = arith.constant 0 : i32
    %c0_i32_1 = arith.constant 0 : i32
    return %arg0, %c0_i32, %c0_i32_0 : i32, i32, i32
  }
}

</mosaic_0001>

<bundles_post_ra>
// kernel: attention_forward.1
= control target key start
LH: loop header
LB: loop body
LE: loop exit
PB: predicated region body
PF: predicated region fallthrough
CT: control target
= control target key end

     0   :  { %13 = vsyncpa [#allocation5], 0  ;;  %s2720_s0 = inlined_call_operand.vmem [shape: f32[2,8,32], index: 0, kind: input, shape index: {}]   ;;  %s2721_s1 = inlined_call_operand.vmem [shape: f32[2,16,32], index: 1, kind: input, shape index: {}]   ;;  %s2722_s2 = inlined_call_operand.vmem [shape: f32[2,16,32], index: 2, kind: input, shape index: {}]   ;;  %s2723_s3 = inlined_call_operand.vmem [shape: f32[2,16,32], index: 3, kind: input, shape index: {}]   ;;  %s2724_s4 = inlined_call_operand.vmem [shape: f32[6,32,32], index: 4, kind: input, shape index: {}]   ;;  %s2725_s5 = inlined_call_operand.hbm [shape: f32[6,32], index: 5, kind: input, shape index: {}]   ;;  %s2726_s6 = inlined_call_operand.hbm [shape: f32[2,8,32], index: 6, kind: output, shape index: {0}]   ;;  %s2727_s7 = inlined_call_operand.hbm [shape: f32[2,8,32], index: 7, kind: output, shape index: {1}]  }
   0x1   :  { %14 = vsyncpa [#allocation6], 0 }
   0x2   :  { %16 = vsyncpa [#allocation6 + $0x1], 0 }
   0x3   :  { %17 = vsyncpa [#allocation9], 0 }
   0x4   :  { %19 = vsyncpa [#allocation9 + $0x1], 0  ;;  %s2312_s24 = smov 0   ;;  %s2314_s25 = smov 0  }
   0x5   :  { %s2316_s26 = smov 0   ;;  %s2318_s27 = smov 0  }
   0x6 LB: > { %s2333_s28 = sadd.s32 4294967295, %s2259_s27   ;;  %s1806_s29 = sadd.s32 4294967294, %s2259_s27   ;;  %s2259_s27 = sphi %s2318_s27, %s2735_s27   ;;  %s2255_s26 = sphi %s2316_s26, %s2734_s26   ;;  %s2251_s25 = sphi %s2314_s25, %s2733_s25   ;;  %s2247_s24 = sphi %s2312_s24, %s2732_s24  }
   0x7   : > { %s2337_s30 = sadd.s32 1, %s2259_s27   ;;  %s178_s8 = sadd.s32 1, %s2255_s26 }
   0x8   : > { %s175_s9 = ssub.s32 %s2259_s27, %s2337_s30  ;;  %p188_p0 = scmp.ne.s32.totalorder %s2255_s26, %s2251_s25 }
   0x9   : > { %p176_p1 = scmp.eq.s32.totalorder %s175_s9, 0  ;;  %p189_p2 = scmp.eq.s32.totalorder %s2333_s28, 1 }
   0xa   : > { %p194_p3 = scmp.ne.s32.totalorder %s2251_s25, %s2247_s24  ;;  %p195_p4 = scmp.eq.s32.totalorder %s1806_s29, 1 }
   0xb   : > { %s2348_s10 = scalar_select %p176_p1, %s2255_s26, %s178_s8  }
   0xc   : > { %p2350_p5 = por %p189_p2, %p188_p0  ;;  %p2354_p6 = por %p195_p4, %p194_p3 }
   0xd   : > { %p1807_p7 = scmp.ge.s32.totalorder %s2259_s27, 1  ;;  %p228_p8 = scmp.lt.s32.totalorder %s2259_s27, 3 }
   0xe   : > { %s2729_s12 = scalar_select %p2354_p6, 1, 0 }
   0xf   : > { %p2079_p9 = scmp.eq.s32.totalorder %s2333_s28, 0  ;;  %p2361_p10 = pnand %p1807_p7, %p228_p8 }
  0x10   : > { %s2261_s14 = smov [#allocation4]  }
  0x11   : > { %s244_s15 = sshll.u32 %s2261_s14, 4  ;;  %p2068_p11 = pneg %p2361_p10  ;;  %s245_s15 = int_to_ptr.vmem [resolvable:$true] %s244_s15 }
  0x12   : > { %s2150_s16 = scalar_lea.vmem %s245_s15, 128  ;;  %p2158_p3 = scmp.lt.s32.totalorder %s245_s15, %s245_s15 }
  0x13   : > { %p2069_p12 = pnand %p2079_p9, %p2068_p11  ;;  %p2151_p0 = scmp.ne.s32.totalorder %s245_s15, %s2150_s16 }
  0x14   : > { %p2159_p4 = scmp.lt.s32.totalorder %s2150_s16, %s2150_s16 }
  0x15   : > { %p2141_p13 = pneg %p2069_p12 }
  0x16   : > { %p2160_p6 = por %p2159_p4, %p2158_p3 }
  0x17   : > { %p2153_p1 = pnand %p2151_p0, %p2141_p13 }
  0x19   : > { %p2154_p2 = pneg %p2153_p1 }
  0x1b   : > { %p2161_p7 = pnand %p2160_p6, %p2154_p2 }
  0x1d   : > { %2164 = shalt.err (!%p2161_p7)
}
  0x1e   : > { %2071 = dma.hbm_to_vmem [thread:$0]  (!%p2069_p12), %s2725_s5, 128, %s245_s15, [#allocation5]  }
  0x1f   : > { %288 = sbr.rel (%p2361_p10) target bundleno = 2839 (0xb17), region = 44 }
  0x24   : > { %2234 = dma.done.wait (%p2079_p9), [#allocation5], 128  }
  0x25   : > { %2236 = vsyncadd (%p2079_p9), [#allocation5], 4294967168  ;;  %p339_p8 = scmp.lt.s32.totalorder %s2333_s28, 1  ;;  %v2262_v0 = vmov 0.0   ;;  %vm2263_vm0 = vmmov 0   ;;  %v1826_v1 = vld [vmem:[%s2724_s4 + $0x38] sm:$0xff] }
  0x26   : > { %1938 = vmatprep.subr.mxu0 %v2262_v0  ;;  %1946 = vmatprep.mubr.msk.f32.mxu0 %vm2263_vm0, %v2262_v0  ;;  %v1825_v2 = vld [vmem:[%s2724_s4 + $0x30] sm:$0xff]  ;;  %v368_v3 = vld [vmem:[%s2724_s4 + $0x18] sm:$0xff]  ;;  %vm374_vm1 = vcmask 261120   ;;  %v1824_v5 = vld [vmem:[%s2724_s4 + $0x28] sm:$0xff]  ;;  %vm721_vm2 = vcmask 64512   ;;  %s2265_s15 = smov 120  }
  0x27   : > { %s340_s19 = scalar_select %p339_p8, %s2333_s28, 1  ;;  %1949 = vmatprep.subr.mxu1 %v1826_v1  ;;  %1939 = vmatpush3.msra.mxu0 %v368_v3  ;;  %v367_v6 = vld [vmem:[%s2724_s4 + $0x10] sm:$0xff]  ;;  %v1823_v7 = vld [vmem:[%s2724_s4 + $0x20] sm:$0xff]  ;;  %v366_v8 = vld [vmem:[%s2724_s4 + $0x8] sm:$0xff]  ;;  %vm801_vm3 = vcmask 130048   ;;  %vm1082_vm4 = vcmask 130112  }
  0x28   : > { %1950 = vmatpush3.msra.mxu1 %v1826_v1  ;;  %1940 = vmatprep.subr.mxu0 %v2262_v0  ;;  %v1840_v10 = vld [vmem:[%s2724_s4 + $0x78] sm:$0xff]  ;;  %v365_v11 = vld [vmem:[%s2724_s4] sm:$0xff]  ;;  %v1839_v12 = vld [vmem:[%s2724_s4 + $0x70] sm:$0xff]  ;;  %s2266_s16 = smov 112   ;;  %s2267_s17 = smov 104   ;;  %vm1269_vm5 = vcmask 195712  }
  0x29   : > { %s2383_s20 = sshll.u32 %s340_s19, 4  ;;  %s1814_s22 = sshll.u32 %s340_s19, 3  ;;  %1951 = vmatprep.subr.mxu1 %v1825_v2  ;;  %1941 = vmatpush3.msra.mxu0 %v367_v6  ;;  %v1838_v15 = vld [vmem:[%s2724_s4 + $0x68] sm:$0xff]  ;;  %v1833_v16 = vld [vmem:[%s2724_s4 + $0x58] sm:$0xff]  ;;  %v1837_v17 = vld [vmem:[%s2724_s4 + $0x60] sm:$0xff]  ;;  %vm1459_vm6 = vcmask 261312  }
  0x2a   : > { %s347_s23 = scalar_lea.vmem %s2721_s1, %s2383_s20  ;;  %1952 = vmatpush3.msra.mxu1 %v1825_v2  ;;  %s342_s19 = scalar_lea.vmem %s2720_s0, %s1814_s22  ;;  %1942 = vmatprep.subr.mxu0 %v2262_v0  ;;  %v1832_v18 = vld [vmem:[%s2724_s4 + $0x50] sm:$0xff]  ;;  %v1831_v20 = vld [vmem:[%s2724_s4 + $0x48] sm:$0xff]  ;;  %v1830_v21 = vld [vmem:[%s2724_s4 + $0x40] sm:$0xff] }
  0x2b   : > { %v359_v4 = vld [vmem:[%s347_s23] sm:$0xff]  ;;  %1953 = vmatprep.subr.mxu1 %v1824_v5  ;;  %v360_v9 = vld [vmem:[%s347_s23 + $0x8] sm:$0xff]  ;;  %s357_s29 = scalar_lea.vmem %s2723_s3, %s2383_s20  ;;  %1943 = vmatpush3.msra.mxu0 %v366_v8  ;;  %s352_s14 = scalar_lea.vmem %s2722_s2, %s2383_s20  ;;  %v1827_v24 = vld [vmem:[#allocation4 + $0x1] ss:$0 sm:$0xff] }
  0x2c   : > { %1957 = vmatprep.mubr.msk.f32.mxu1 %vm374_vm1, %v359_v4  ;;  %1954 = vmatpush3.msra.mxu1 %v1824_v5  ;;  %v358_v13 = vld [vmem:[%s342_s19] sm:$0xff]  ;;  %v364_v19 = vld [vmem:[%s357_s29 + $0x8] sm:$0xff]  ;;  %v1821_v29 = vld [vmem:[#allocation4] ss:$0 sm:$0xff]  ;;  %s2264_s20 = smov 8   ;;  %s2268_s19 = smov 16  }
  0x2d   : > { %1955 = vmatprep.subr.mxu1 %v1823_v7  ;;  %1944 = vmatprep.subr.mxu0 %v2262_v0  ;;  %v363_v14 = vld [vmem:[%s357_s29] sm:$0xff]  ;;  %v362_v23 = vld [vmem:[%s352_s14 + $0x8] sm:$0xff]  ;;  %v1841_v33 = vld [vmem:[#allocation4 + $0x3] ss:$0 sm:$0xff]  ;;  %s2269_s9 = smov 24   ;;  %s2641_s22 = sand.u32 1, %s2251_s25  }
  0x2e   : > { %1956 = vmatpush3.msra.mxu1 %v1823_v7  ;;  %1945 = vmatpush3.msra.mxu0 %v365_v11  ;;  %v361_v22 = vld [vmem:[%s352_s14] sm:$0xff]  ;;  %v1834_v39 = vld [vmem:[#allocation4 + $0x2] ss:$0 sm:$0xff]  ;;  %s1812_s13 = sshll.u32 %s2641_s22, 3  ;;  %s1874_s29 = sshll.u32 %s2333_s28, 7 }
  0x2f   : > { %1958 = vmatmul.mubr.msk.f32.vlgmr.msra.gmra.mxu1 %vm374_vm1, %v360_v9  ;;  %1971 = vmatprep.subr.mxu1 %v1840_v10  ;;  %s338_s14 = scalar_lea.vmem [#allocation8], %s1812_s13  ;;  %s2655_s21 = scalar_lea.hbm %s2727_s7, %s1874_s29 }
  0x30   : > { %1972 = vmatpush3.msra.mxu1 %v1840_v10  ;;  %1947 = vmatmul.mubr.msk.f32.vlgmr.msra.gmra.mxu0 %vm374_vm1, %v358_v13  ;;  %s1636_s8 = scalar_lea.sflag [#allocation6], %s2641_s22 }
  0x31   : > { %1973 = vmatprep.subr.mxu1 %v1839_v12  ;;  %1979 = vmatprep.mubr.msk.f32.mxu1 %vm374_vm1, %v363_v14 }
  0x32   : > { %1974 = vmatpush3.msra.mxu1 %v1839_v12  ;;  %1960 = vmatprep.subr.mxu0 %v1833_v16 }
  0x33   : > { %1975 = vmatprep.subr.mxu1 %v1838_v15  ;;  %1961 = vmatpush3.msra.mxu0 %v1833_v16 }
  0x34   : > { %1976 = vmatpush3.msra.mxu1 %v1838_v15  ;;  %1962 = vmatprep.subr.mxu0 %v1832_v18 }
  0x35   : > { %1977 = vmatprep.subr.mxu1 %v1837_v17  ;;  %1963 = vmatpush3.msra.mxu0 %v1832_v18 }
  0x36   : > { %1978 = vmatpush3.msra.mxu1 %v1837_v17  ;;  %1964 = vmatprep.subr.mxu0 %v1831_v20 }
  0x37   : > { %1980 = vmatmul.mubr.msk.f32.vlgmr.msra.gmra.mxu1 %vm374_vm1, %v364_v19  ;;  %1965 = vmatpush3.msra.mxu0 %v1831_v20 }
  0x38   : > { %1989 = vmatprep.subr.mxu1 %v2262_v0  ;;  %1966 = vmatprep.subr.mxu0 %v1830_v21 }
  0x39   : > { %1993 = vmatprep.mubr.msk.f32.mxu1 %vm2263_vm0, %v2262_v0  ;;  %1967 = vmatpush3.msra.mxu0 %v1830_v21 }
  0x3a   : > { %1982 = vmatprep.subr.mxu0 %v2262_v0  ;;  %1968 = vmatprep.mubr.msk.f32.mxu0 %vm374_vm1, %v361_v22 }
  0x3b   : > { %1969 = vmatmul.mubr.msk.f32.vlgmr.msra.gmra.mxu0 %vm374_vm1, %v362_v23 }
  0x3c   : > { %1986 = vmatprep.mubr.msk.f32.mxu0 %vm2263_vm0, %v2262_v0 }
  0xef   : > { %v1959_v25 = vpop.f32.mrf.mxu1 }
  0xf0   : > { %v2464_v26 = vadd.f32 %v1959_v25, %v1827_v24  ;;  %v444_v28 = vpop.f32.mrf.mxu0 }
  0xf1   : > { %v530_v27 = vpop.f32.mrf.mxu1  ;;  %v2471_v32 = vadd.f32 %v1821_v29, %v444_v28 }
  0xf2   : > { %1983 = vmatpush3.xpose.msk.msra.mxu0 %vm721_vm2, %v2464_v26  ;;  %v1948_v30 = vpop.f32.mrf.mxu0  ;;  %v2469_v31 = vadd.f32 %v1827_v24, %v530_v27 }
  0xf3   : > { %1984 = vmatprep.subr.mxu0 %v2262_v0 }
  0xf6   : > { %1985 = vmatpush3.xpose.msk.msra.mxu0 %vm721_vm2, %v2469_v31 }
  0xf7   : > { %v1981_v34 = vpop.f32.mrf.mxu1  ;;  %2003 = vmatprep.subr.mxu0 %v2262_v0 }
  0xf8   : > { %v2476_v35 = vadd.f32 %v1981_v34, %v1841_v33 }
  0xf9   : > { %1987 = vmatmul.mubr.msk.f32.vlgmr.msra.gmra.mxu0 %vm721_vm2, %v2471_v32  ;;  %v712_v36 = vpop.f32.mrf.mxu1 }
  0xfa   : > { %817 = vrot.lane.b32.xlu1 %v2476_v35, %s2264_s20  ;;  %v2482_v37 = vadd.f32 %v1841_v33, %v712_v36  ;;  %2007 = vmatprep.mubr.msk.f32.mxu0 %vm2263_vm0, %v2262_v0 }
  0xfb   : > { %v1970_v38 = vpop.f32.mrf.mxu0 }
  0xfc   : > { %v2492_v40 = vadd.f32 %v1970_v38, %v1834_v39 }
  0xfd   : > { %v621_v41 = vpop.f32.mrf.mxu0 }
  0xfe   : > { %815 = vrot.lane.b32.xlu1 %v2482_v37, %s2264_s20  ;;  %v2494_v43 = vadd.f32 %v1834_v39, %v621_v41 }
 0x102   : > { %904 = vrot.lane.b32.xlu1 %v2469_v31, %s2265_s15 }
 0x106   : > { %902 = vrot.lane.b32.xlu1 %v2471_v32, %s2265_s15 }
 0x16c   : > { %v818_v42 = vpop.permute.xlu1 %817 }
 0x16d   : > { %v822_v44 = vsel %vm721_vm2, %v2492_v40, %v818_v42 }
 0x16e   : > { %1990 = vmatpush3.msra.mxu1 %v822_v44 }
 0x16f   : > { %1991 = vmatprep.subr.mxu1 %v2262_v0 }
 0x170   : > { %v816_v45 = vpop.permute.xlu1 %815 }
 0x171   : > { %v821_v46 = vsel %vm721_vm2, %v2494_v43, %v816_v45 }
 0x172   : > { %1992 = vmatpush3.msra.mxu1 %v821_v46 }
 0x173   : > { %1996 = vmatprep.subr.mxu1 %v2262_v0 }
 0x174   : > { %v905_v59 = vpop.permute.xlu1 %904 }
 0x178   : > { %v903_v60 = vpop.permute.xlu1 %902 }
 0x1b9   : > { %v797_v47 = vpop.f32.mrf.mxu0 }
 0x1ba   : > { %v802_v48 = vsel %vm801_vm3, %v797_v47, -inf }
 0x1bb   : > { %803 = vmax.xlane.f32.xlu0 %v802_v48  ;;  %v1988_v49 = vpop.f32.mrf.mxu0 }
 0x244   : > { %v804_v50 = vpop.xlane.xlu0 %803 }
 0x245   : > { %v805_v51 = vsub.f32 %v797_v47, %v804_v50 }
 0x247   : > { %v806_v52 = vmul.f32 1.442695, %v805_v51 }
 0x249   : > { %2123 = vpow2.f32 %v806_v52 }
 0x256   : > { %v2124_v53 = vpop.eup %2123 }
 0x257   : > { %v808_v54 = vsel %vm801_vm3, %v2124_v53, 0.0 }
 0x258   : > { %809 = vadd.xlane.f32.xlu0 %v808_v54 }
 0x26e   : > { %906 = vrot.lane.b32.xlu0 %v2464_v26, %s2265_s15 }
 0x2e1   : > { %v810_v55 = vpop.xlane.xlu0 %809 }
 0x2e2   : > { %2125 = vrcp.f32 %v810_v55 }
 0x2e5   : > { %v907_v58 = vpop.permute.xlu0 %906 }
 0x2ef   : > { %v2126_v56 = vpop.eup %2125 }
 0x2f0   : > { %v812_v57 = vmul.f32 %v2126_v56, %v2124_v53 }
 0x2f2   : > { %1994 = vmatmul.mubr.msk.f32.vlgmr.msra.gmra.mxu1 %vm801_vm3, %v812_v57 }
 0x2f3   : > { %1997 = vmatpush3.xpose.msk.msra.mxu1 %vm721_vm2, %v907_v58  ;;  %2000 = vmatprep.mubr.msk.f32.mxu1 %vm2263_vm0, %v2262_v0 }
 0x2f4   : > { %1998 = vmatprep.subr.mxu1 %v2262_v0 }
 0x2f7   : > { %1999 = vmatpush3.xpose.msk.msra.mxu1 %vm721_vm2, %v905_v59 }
 0x2f8   : > { %2017 = vmatprep.subr.mxu1 %v2262_v0 }
 0x2fa   : > { %2001 = vmatmul.mubr.msk.f32.vlgmr.msra.gmra.mxu1 %vm721_vm2, %v903_v60 }
 0x2fb   : > { %2021 = vmatprep.mubr.msk.f32.mxu1 %vm2263_vm0, %v2262_v0 }
 0x3b2   : > { %v2516_v61 = vpop.f32.mrf.mxu1 }
 0x3b3   : > { %896 = vst.msk [vmem:[#allocation2] sm:$0xff] %vm721_vm2, %v2516_v61 }
 0x3b4   : > { %v1995_v62 = vpop.f32.mrf.mxu1 }
 0x3ba   : > { %v980_v63 = vpop.f32.mrf.mxu1 }
 0x3bb   : > { %v984_v1 = vsel %vm801_vm3, %v980_v63, -inf }
 0x3bc   : > { %985 = vmax.xlane.f32.xlu1 %v984_v1  ;;  %v2002_v2 = vpop.f32.mrf.mxu1  ;;  %v1869_v1 = vld [vmem:[%s2724_s4 + $0xb8] sm:$0xff] }
 0x3bd   : > { %v1862_v2 = vld [vmem:[%s2724_s4 + $0x90] sm:$0xff] }
 0x3cd   : > { %999 = vrot.lane.b32.xlu1 %v2492_v40, %s2265_s15 }
 0x3d1   : > { %1089 = vrot.lane.b32.xlu1 %v2464_v26, %s2266_s16 }
 0x3d5   : > { %1087 = vrot.lane.b32.xlu1 %v2469_v31, %s2266_s16 }
 0x3d9   : > { %1085 = vrot.lane.b32.xlu1 %v2471_v32, %s2266_s16 }
 0x445   : > { %v986_v3 = vpop.xlane.xlu1 %985 }
 0x446   : > { %v987_v4 = vsub.f32 %v980_v63, %v986_v3  ;;  %v1863_v63 = vld [vmem:[%s2724_s4 + $0x98] sm:$0xff]  ;;  %v1868_v3 = vld [vmem:[%s2724_s4 + $0xb0] sm:$0xff] }
 0x448   : > { %v988_v5 = vmul.f32 1.442695, %v987_v4  ;;  %v1861_v4 = vld [vmem:[%s2724_s4 + $0x88] sm:$0xff] }
 0x449   : > { %v1000_v6 = vpop.permute.xlu1 %999 }
 0x44a   : > { %2127 = vpow2.f32 %v988_v5  ;;  %v1004_v7 = vsel %vm721_vm2, %v1000_v6, %v2476_v35  ;;  %v1867_v5 = vld [vmem:[%s2724_s4 + $0xa8] sm:$0xff]  ;;  %v1860_v6 = vld [vmem:[%s2724_s4 + $0x80] sm:$0xff] }
 0x44b   : > { %2004 = vmatpush3.msra.mxu0 %v1004_v7  ;;  %v1866_v7 = vld [vmem:[%s2724_s4 + $0xa0] sm:$0xff] }
 0x44c   : > { %2005 = vmatprep.subr.mxu0 %v2262_v0 }
 0x44d   : > { %v1090_v13 = vpop.permute.xlu1 %1089 }
 0x451   : > { %v1088_v16 = vpop.permute.xlu1 %1087 }
 0x455   : > { %v1086_v17 = vpop.permute.xlu1 %1085 }
 0x457   : > { %v2128_v8 = vpop.eup %2127 }
 0x458   : > { %v990_v9 = vsel %vm801_vm3, %v2128_v8, 0.0 }
 0x459   : > { %991 = vadd.xlane.f32.xlu0 %v990_v9 }
 0x46f   : > { %997 = vrot.lane.b32.xlu0 %v2494_v43, %s2265_s15 }
 0x473   : > { %1180 = vrot.lane.b32.xlu0 %v2492_v40, %s2266_s16 }
 0x4e2   : > { %v992_v10 = vpop.xlane.xlu0 %991 }
 0x4e3   : > { %2129 = vrcp.f32 %v992_v10 }
 0x4e6   : > { %v998_v11 = vpop.permute.xlu0 %997 }
 0x4e7   : > { %v1003_v12 = vsel %vm721_vm2, %v998_v11, %v2482_v37 }
 0x4e8   : > { %2006 = vmatpush3.msra.mxu0 %v1003_v12 }
 0x4e9   : > { %2010 = vmatprep.subr.mxu0 %v2262_v0 }
 0x4ea   : > { %v1181_v27 = vpop.permute.xlu0 %1180 }
 0x4f0   : > { %v2130_v14 = vpop.eup %2129 }
 0x4f1   : > { %v994_v15 = vmul.f32 %v2130_v14, %v2128_v8  ;;  %v1870_v14 = vld [vmem:[#allocation4 + $0x5] ss:$0 sm:$0xff] }
 0x4f3   : > { %2008 = vmatmul.mubr.msk.f32.vlgmr.msra.gmra.mxu0 %vm801_vm3, %v994_v15 }
 0x4f4   : > { %2011 = vmatpush3.xpose.msk.msra.mxu0 %vm721_vm2, %v1090_v13  ;;  %2014 = vmatprep.mubr.msk.f32.mxu0 %vm2263_vm0, %v2262_v0 }
 0x4f5   : > { %2012 = vmatprep.subr.mxu0 %v2262_v0 }
 0x4f8   : > { %2013 = vmatpush3.xpose.msk.msra.mxu0 %vm721_vm2, %v1088_v16 }
 0x4f9   : > { %2031 = vmatprep.subr.mxu0 %v2262_v0 }
 0x4fb   : > { %2015 = vmatmul.mubr.msk.f32.vlgmr.msra.gmra.mxu0 %vm721_vm2, %v1086_v17 }
 0x4fc   : > { %2035 = vmatprep.mubr.msk.f32.mxu0 %vm2263_vm0, %v2262_v0 }
 0x5b3   : > { %v2550_v18 = vpop.f32.mrf.mxu0 }
 0x5b5   : > { %v2009_v19 = vpop.f32.mrf.mxu0 }
 0x5bb   : > { %v1163_v20 = vpop.f32.mrf.mxu0 }
 0x5bc   : > { %v1167_v21 = vsel %vm801_vm3, %v1163_v20, -inf }
 0x5bd   : > { %1168 = vmax.xlane.f32.xlu1 %v1167_v21  ;;  %v2016_v22 = vpop.f32.mrf.mxu0 }
 0x5ce   : > { %1186 = vrot.lane.b32.xlu1 %v2476_v35, %s2265_s15 }
 0x5d2   : > { %1178 = vrot.lane.b32.xlu1 %v2494_v43, %s2266_s16 }
 0x5d6   : > { %1279 = vrot.lane.b32.xlu1 %v2464_v26, %s2267_s17 }
 0x5da   : > { %1275 = vrot.lane.b32.xlu1 %v2471_v32, %s2267_s17 }
 0x5de   : > { %1376 = vrot.lane.b32.xlu1 %v2476_v35, %s2266_s16 }
 0x646   : > { %v1169_v23 = vpop.xlane.xlu1 %1168 }
 0x647   : > { %v1170_v24 = vsub.f32 %v1163_v20, %v1169_v23 }
 0x649   : > { %v1171_v25 = vmul.f32 1.442695, %v1170_v24 }
 0x64a   : > { %v1187_v28 = vpop.permute.xlu1 %1186 }
 0x64b   : > { %2131 = vpow2.f32 %v1171_v25  ;;  %v1191_v29 = vsel %vm721_vm2, %v1181_v27, %v1187_v28 }
 0x64c   : > { %2018 = vmatpush3.msra.mxu1 %v1191_v29 }
 0x64d   : > { %2019 = vmatprep.subr.mxu1 %v2262_v0 }
 0x64e   : > { %v1179_v33 = vpop.permute.xlu1 %1178 }
 0x652   : > { %v1280_v39 = vpop.permute.xlu1 %1279 }
 0x656   : > { %v1276_v41 = vpop.permute.xlu1 %1275 }
 0x658   : > { %v2132_v30 = vpop.eup %2131 }
 0x659   : > { %v1173_v26 = vsel %vm801_vm3, %v2132_v30, 0.0 }
 0x65a   : > { %1174 = vadd.xlane.f32.xlu0 %v1173_v26  ;;  %v1377_v51 = vpop.permute.xlu1 %1376 }
 0x670   : > { %1184 = vrot.lane.b32.xlu0 %v2482_v37, %s2265_s15 }
 0x674   : > { %1277 = vrot.lane.b32.xlu0 %v2469_v31, %s2267_s17 }
 0x6e3   : > { %v1175_v32 = vpop.xlane.xlu0 %1174 }
 0x6e4   : > { %2133 = vrcp.f32 %v1175_v32 }
 0x6e7   : > { %v1185_v34 = vpop.permute.xlu0 %1184 }
 0x6e8   : > { %v1190_v35 = vsel %vm721_vm2, %v1179_v33, %v1185_v34 }
 0x6e9   : > { %2020 = vmatpush3.msra.mxu1 %v1190_v35 }
 0x6ea   : > { %2024 = vmatprep.subr.mxu1 %v2262_v0 }
 0x6eb   : > { %v1278_v31 = vpop.permute.xlu0 %1277 }
 0x6f1   : > { %v2134_v36 = vpop.eup %2133 }
 0x6f2   : > { %v1177_v38 = vmul.f32 %v2134_v36, %v2132_v30 }
 0x6f4   : > { %2022 = vmatmul.mubr.msk.f32.vlgmr.msra.gmra.mxu1 %vm801_vm3, %v1177_v38 }
 0x6f5   : > { %2025 = vmatpush3.xpose.msk.msra.mxu1 %vm721_vm2, %v1280_v39  ;;  %2028 = vmatprep.mubr.msk.f32.mxu1 %vm2263_vm0, %v2262_v0 }
 0x6f6   : > { %2026 = vmatprep.subr.mxu1 %v2262_v0 }
 0x6f9   : > { %2027 = vmatpush3.xpose.msk.msra.mxu1 %vm721_vm2, %v1278_v31 }
 0x6fa   : > { %2049 = vmatprep.subr.mxu1 %v2262_v0 }
 0x6fc   : > { %2029 = vmatmul.mubr.msk.f32.vlgmr.msra.gmra.mxu1 %vm721_vm2, %v1276_v41 }
 0x6fd   : > { %2057 = vmatprep.mubr.msk.f32.mxu1 %vm2263_vm0, %v2262_v0  ;;  %2050 = vmatpush3.msra.mxu1 %v1869_v1 }
 0x6fe   : > { %2051 = vmatprep.subr.mxu1 %v2262_v0 }
 0x6ff   : > { %2052 = vmatpush3.msra.mxu1 %v1868_v3 }
 0x700   : > { %2053 = vmatprep.subr.mxu1 %v2262_v0 }
 0x701   : > { %2054 = vmatpush3.msra.mxu1 %v1867_v5 }
 0x702   : > { %2055 = vmatprep.subr.mxu1 %v2262_v0 }
 0x703   : > { %2056 = vmatpush3.msra.mxu1 %v1866_v7 }
 0x7b4   : > { %v1261_v42 = vpop.f32.mrf.mxu1 }
 0x7b6   : > { %v2023_v44 = vpop.f32.mrf.mxu1 }
 0x7bc   : > { %v1353_v45 = vpop.f32.mrf.mxu1 }
 0x7bd   : > { %v1357_v46 = vsel %vm801_vm3, %v1353_v45, -inf }
 0x7be   : > { %1358 = vmax.xlane.f32.xlu0 %v1357_v46  ;;  %v2030_v47 = vpop.f32.mrf.mxu1 }
 0x7d4   : > { %1370 = vrot.lane.b32.xlu0 %v2492_v40, %s2267_s17 }
 0x7d8   : > { %1368 = vrot.lane.b32.xlu0 %v2494_v43, %s2267_s17  ;;  %s2648_s17 = scalar_lea.hbm %s2726_s6, %s1874_s29 }
 0x7dc   : > { %898 = vrot.lane.b32.xlu0 %v2516_v61, %s2265_s15 }
 0x7e0   : > { %1266 = vrot.lane.b32.xlu0 %v1261_v42, %s2268_s19 }
 0x847   : > { %v1359_v48 = vpop.xlane.xlu0 %1358 }
 0x848   : > { %v1360_v49 = vsub.f32 %v1353_v45, %v1359_v48 }
 0x84a   : > { %v1361_v50 = vmul.f32 1.442695, %v1360_v49 }
 0x84b   : > { %v1371_v52 = vpop.permute.xlu0 %1370 }
 0x84c   : > { %2135 = vpow2.f32 %v1361_v50  ;;  %v1381_v53 = vsel %vm721_vm2, %v1371_v52, %v1377_v51 }
 0x84d   : > { %2032 = vmatpush3.msra.mxu0 %v1381_v53 }
 0x84e   : > { %2033 = vmatprep.subr.mxu0 %v2262_v0 }
 0x84f   : > { %v1369_v40 = vpop.permute.xlu0 %1368 }
 0x853   : > { %v899_v43 = vpop.permute.xlu0 %898 }
 0x854   : > { %901 = vst.msk [vmem:[#allocation3] sm:$0xff] %vm721_vm2, %v899_v43 }
 0x855   : > { %1084 = vst.msk [vmem:[#allocation3] sm:$0xff] %vm1082_vm4, %v2550_v18 }
 0x857   : > { %v1267_v60 = vpop.permute.xlu0 %1266 }
 0x859   : > { %v2136_v54 = vpop.eup %2135 }
 0x85a   : > { %v1363_v55 = vsel %vm801_vm3, %v2136_v54, 0.0 }
 0x85b   : > { %1364 = vadd.xlane.f32.xlu1 %v1363_v55 }
 0x86c   : > { %1374 = vrot.lane.b32.xlu1 %v2482_v37, %s2266_s16 }
 0x870   : > { %1079 = vrot.lane.b32.xlu1 %v2550_v18, %s2264_s20 }
 0x874   : > { %1271 = vrot.lane.b32.xlu1 %v1261_v42, %s2264_s20  ;;  %s1667_s20 = sshll.u32 %s338_s14, 4  ;;  %s2657_s20 = int_to_ptr.vmem [resolvable:$true] %s1667_s20 }
 0x8e4   : > { %v1365_v56 = vpop.xlane.xlu1 %1364 }
 0x8e5   : > { %2137 = vrcp.f32 %v1365_v56 }
 0x8e8   : > { %v1375_v57 = vpop.permute.xlu1 %1374 }
 0x8e9   : > { %v1380_v58 = vsel %vm721_vm2, %v1369_v40, %v1375_v57 }
 0x8ea   : > { %2034 = vmatpush3.msra.mxu0 %v1380_v58 }
 0x8eb   : > { %2038 = vmatprep.subr.mxu0 %v2262_v0 }
 0x8ec   : > { %v1080_v59 = vpop.permute.xlu1 %1079 }
 0x8ed   : > { %1083 = vst.msk [vmem:[#allocation2] sm:$0xff] %vm1082_vm4, %v1080_v59 }
 0x8ee   : > { %1270 = vst.msk [vmem:[#allocation2] sm:$0xff] %vm1269_vm5, %v1267_v60 }
 0x8f0   : > { %v1272_v37 = vpop.permute.xlu1 %1271 }
 0x8f1   : > { %1274 = vst.msk [vmem:[#allocation3] sm:$0xff] %vm1269_vm5, %v1272_v37 }
 0x8f2   : > { %v2138_v61 = vpop.eup %2137 }
 0x8f3   : > { %v1367_v62 = vmul.f32 %v2138_v61, %v2136_v54 }
 0x8f5   : > { %2036 = vmatmul.mubr.msk.f32.vlgmr.msra.gmra.mxu0 %vm801_vm3, %v1367_v62 }
 0x8f6   : > { %2046 = vmatprep.mubr.msk.f32.mxu0 %vm2263_vm0, %v2262_v0  ;;  %2039 = vmatpush3.msra.mxu0 %v1863_v63 }
 0x8f7   : > { %2040 = vmatprep.subr.mxu0 %v2262_v0 }
 0x8f8   : > { %2041 = vmatpush3.msra.mxu0 %v1862_v2 }
 0x8f9   : > { %2042 = vmatprep.subr.mxu0 %v2262_v0 }
 0x8fa   : > { %2043 = vmatpush3.msra.mxu0 %v1861_v4 }
 0x8fb   : > { %2044 = vmatprep.subr.mxu0 %v2262_v0  ;;  %v1864_v0 = vld [vmem:[#allocation4 + $0x4] ss:$0 sm:$0xff] }
 0x8fc   : > { %2045 = vmatpush3.msra.mxu0 %v1860_v6 }
 0x9b5   : > { %v1451_v8 = vpop.f32.mrf.mxu0 }
 0x9b6   : > { %1461 = vrot.lane.b32.xlu1 %v1451_v8, %s2268_s19  ;;  %1456 = vrot.lane.b32.xlu0 %v1451_v8, %s2269_s9  ;;  %s331_s19 = scalar_lea.vmem [#allocation7], %s1812_s13  ;;  %s2270_s13 = smov [#allocation7]  }
 0x9b7   : > { %v2037_v9 = vpop.f32.mrf.mxu0  ;;  %s1654_s23 = sshll.u32 %s331_s19, 4  ;;  %s2169_s15 = sshll.u32 %s2270_s13, 4  ;;  %s2650_s23 = int_to_ptr.vmem [resolvable:$true] %s1654_s23  ;;  %s2170_s15 = int_to_ptr.vmem [resolvable:$false] %s2169_s15 }
 0x9b8   : > { %s2165_s9 = scalar_lea.vmem %s2650_s23, 128  ;;  %s2171_s16 = scalar_lea.vmem %s2170_s15, 256 }
 0x9b9   : > { %p2166_p6 = scmp.ne.s32.totalorder %s2650_s23, %s2165_s9  ;;  %p2172_p11 = scmp.lt.s32.totalorder %s2650_s23, %s2170_s15 }
 0x9ba   : > { %p2173_p12 = scmp.lt.s32.totalorder %s2171_s16, %s2165_s9 }
 0x9bb   : > { %p2167_p9 = pnand %p2166_p6, %p2350_p5 }
 0x9bc   : > { %p2174_p13 = por %p2173_p12, %p2172_p11 }
 0x9bd   : > { %p2168_p10 = pneg %p2167_p9 }
 0x9bf   : > { %p2175_p0 = pnand %p2174_p13, %p2168_p10 }
 0xa28   : > { %v1462_v10 = vpop.permute.xlu1 %1461  ;;  %v1457_v11 = vpop.permute.xlu0 %1456 }
 0xa29   : > { %1464 = vst.msk [vmem:[#allocation3] sm:$0xff] %vm1459_vm6, %v1462_v10  ;;  %1460 = vst.msk [vmem:[#allocation2] sm:$0xff] %vm1459_vm6, %v1457_v11 }
 0xa30   : > { %v1465_v12 = vld [vmem:[#allocation2] sm:$0xff]  ;;  %v1549_v13 = vld [vmem:[#allocation3] sm:$0xff] }
 0xa31   : > { %2047 = vmatmul.mubr.msk.f32.vlgmr.msra.gmra.mxu0 %vm374_vm1, %v1465_v12  ;;  %2058 = vmatmul.mubr.msk.f32.vlgmr.msra.gmra.mxu1 %vm374_vm1, %v1549_v13 }
 0xaf1   : > { %v1545_v15 = vpop.f32.mrf.mxu0  ;;  %v1629_v16 = vpop.f32.mrf.mxu1 }
 0xaf2   : > { %v1546_v17 = vadd.f32 %v1864_v0, %v1545_v15  ;;  %v1630_v18 = vadd.f32 %v1870_v14, %v1629_v16 }
 0xaf3   : > { %v2048_v19 = vpop.f32.mrf.mxu0  ;;  %v2059_v20 = vpop.f32.mrf.mxu1 }
 0xaf4   : > { %1633 = vst.msk [vmem:[%s331_s19] sm:$0xff] %vm374_vm1, %v1546_v17  ;;  %1634 = vst.msk [vmem:[%s338_s14] sm:$0xff] %vm374_vm1, %v1630_v18 }
 0xaf5   : > { %2178 = shalt.err (!%p2175_p0)
}
 0xaf6   : > { %s2179_s29 = scalar_lea.hbm %s2648_s17, 128  ;;  %s2183_s28 = scalar_lea.hbm %s2726_s6, 256 }
 0xaf7   : > { %p2180_p1 = scmp.ne.s32.totalorder %s2648_s17, %s2179_s29  ;;  %p2184_p4 = scmp.lt.s32.totalorder %s2648_s17, %s2726_s6 }
 0xaf8   : > { %p2185_p7 = scmp.lt.s32.totalorder %s2183_s28, %s2179_s29 }
 0xaf9   : > { %p2181_p2 = pnand %p2180_p1, %p2350_p5 }
 0xafa   : > { %p2186_p8 = por %p2185_p7, %p2184_p4 }
 0xafb   : > { %p2182_p3 = pneg %p2181_p2 }
 0xafd   : > { %p2187_p6 = pnand %p2186_p8, %p2182_p3 }
 0xaff   : > { %2190 = shalt.err (!%p2187_p6)
}
 0xb00   : > { %2064 = dma.vmem_to_hbm [thread:$0]  (%p2350_p5), %s2650_s23, 128, %s2648_s17, %s1636_s8  }
 0xb01   : > { %s1641_s9 = scalar_lea.sflag [#allocation9], %s2641_s22  ;;  %s2191_s15 = scalar_lea.vmem %s2657_s20, 128 }
 0xb02   : > { %p2192_p9 = scmp.ne.s32.totalorder %s2657_s20, %s2191_s15  ;;  %s2271_s16 = smov [#allocation8]  }
 0xb03   : > { %s2195_s29 = sshll.u32 %s2271_s16, 4  ;;  %s2196_s29 = int_to_ptr.vmem [resolvable:$false] %s2195_s29 }
 0xb04   : > { %p2193_p10 = pnand %p2192_p9, %p2350_p5  ;;  %s2197_s19 = scalar_lea.vmem %s2196_s29, 256 }
 0xb05   : > { %p2198_p12 = scmp.lt.s32.totalorder %s2657_s20, %s2196_s29  ;;  %p2199_p13 = scmp.lt.s32.totalorder %s2197_s19, %s2191_s15 }
 0xb06   : > { %p2194_p11 = pneg %p2193_p10 }
 0xb07   : > { %p2200_p0 = por %p2199_p13, %p2198_p12 }
 0xb09   : > { %p2201_p1 = pnand %p2200_p0, %p2194_p11 }
 0xb0b   : > { %2204 = shalt.err (!%p2201_p1)
}
 0xb0c   : > { %s2205_s23 = scalar_lea.hbm %s2655_s21, 128  ;;  %s2209_s8 = scalar_lea.hbm %s2727_s7, 256 }
 0xb0d   : > { %p2206_p2 = scmp.ne.s32.totalorder %s2655_s21, %s2205_s23  ;;  %p2210_p7 = scmp.lt.s32.totalorder %s2655_s21, %s2727_s7 }
 0xb0e   : > { %p2211_p8 = scmp.lt.s32.totalorder %s2209_s8, %s2205_s23 }
 0xb0f   : > { %p2207_p3 = pnand %p2206_p2, %p2350_p5 }
 0xb10   : > { %p2212_p6 = por %p2211_p8, %p2210_p7 }
 0xb11   : > { %p2208_p4 = pneg %p2207_p3 }
 0xb13   : > { %p2213_p9 = pnand %p2212_p6, %p2208_p4 }
 0xb15   : > { %2216 = shalt.err (!%p2213_p9)
}
 0xb16   : > { %2065 = dma.vmem_to_hbm [thread:$0]  (%p2350_p5), %s2657_s20, 128, %s2655_s21, %s1641_s9  }
 0xb17 PF: > { %p2081_p10 = scmp.ge.s32.totalorder %s2259_s27, 2  ;;  %s1679_s18 = sand.u32 1, %s2247_s24  }
 0xb18   : > { %p2731_p11 = scmp.ne.s32.totalorder %s2729_s12, 0  ;;  %s1680_s13 = scalar_lea.sflag [#allocation6], %s1679_s18 }
 0xb1a   : > { %p2073_p12 = pnand %p2081_p10, %p2731_p11 }
 0xb1c   : > { %p2074_p13 = pneg %p2073_p12 }
 0xb1e   : > { %2238 = dma.done.wait (%p2074_p13), %s1680_s13, 128  }
 0xb1f   : > { %2240 = vsyncadd (%p2074_p13), %s1680_s13, 4294967168  ;;  %s1689_s15 = scalar_lea.sflag [#allocation9], %s1679_s18 }
 0xb20   : > { %2242 = dma.done.wait (%p2074_p13), %s1689_s15, 128  }
 0xb21   : > { %2244 = vsyncadd (%p2074_p13), %s1689_s15, 4294967168  ;;  %p22_p5 = scmp.ge.s32.totalorder %s2337_s30, 4   ;;  %s2732_s24 = smov %s2251_s25 }
 0xb22   : > { %s2733_s25 = smov %s2255_s26  ;;  %s2734_s26 = smov %s2348_s10 }
 0xb23   : > { %s2735_s27 = smov %s2337_s30  ;;  %24 = sbr.rel (!%p22_p5) target bundleno = 6 (0x6), region = 115 }
 0xb28   :  { %1694 = vsyncpa [#allocation5], 1 }
 0xb29   :  { %1696 = vsyncpa [#allocation5 + $0x1], 1 }
 0xb2a   :  { %1697 = vsyncpa [#allocation6], 1 }
 0xb2b   :  { %1699 = vsyncpa [#allocation6 + $0x1], 1 }
 0xb2c   :  { %1700 = vsyncpa [#allocation9], 1 }
 0xb2d   :  { %1702 = vsyncpa [#allocation9 + $0x1], 1 }

</bundles_post_ra>
